<compile_context>
chip_gen: v7x
topology: tpu7x:2x2x1
jax: 0.10.0
libtpu: 0.0.40
codegen_flags: <defaults>
</compile_context>

<pallas_src>
import functools

import jax
import jax.numpy as jnp
from jax import lax
from jax.experimental import pallas as pl
from jax.experimental.pallas import tpu as pltpu


# ------------------------------ sizing helpers -------------------------------

def _vmem_limits():
    """(vmem_limit_bytes, block_budget_bytes), generation-aware."""
    try:
        cap = int(pltpu.get_tpu_info().vmem_capacity_bytes)
    except Exception:
        cap = 64 * 1024 * 1024            # conservative fallback (v7x physical)
    limit = (cap * 3) // 4                # ~48 MiB on v7x, ~96 MiB on v5e/v6e
    budget = (limit * 3) // 5             # headroom for compiler temporaries
    return limit, budget


def _pick_tile(n, max_tile, *, align=8, min_steps=1):
    """Largest divisor of n <= max_tile that is a multiple of `align`
    (preferring 128-aligned tiles), optionally capped so the grid axis gets at
    least `min_steps` steps.  Falls back to the full dim when no aligned
    divisor exists (a full-extent block is always legal)."""
    caps = []
    if min_steps > 0 and n // min_steps >= align:
        caps.append(min(max_tile, n // min_steps))
    caps.append(min(max_tile, n))
    for cap in caps:
        if cap < align:
            continue
        for a in (128, align):
            if a > cap:
                continue
            t = (cap // a) * a
            while t >= a:
                if n % t == 0:
                    return t
                t -= a
    return n


# --------------------------- fused K/V/Q projection ---------------------------

def _qkv_kernel(*refs, shared):
    if shared:
        x_ref, wk_ref, wv_ref, wq_ref, bk_ref, bv_ref, bq_ref, o_ref = refs
        kx = vx = qx = x_ref[...]                 # self-attention: read x once
    else:
        (kx_ref, vx_ref, qx_ref, wk_ref, wv_ref, wq_ref,
         bk_ref, bv_ref, bq_ref, o_ref) = refs
        kx, vx, qx = kx_ref[...], vx_ref[...], qx_ref[...]
    # Plain NN dots (weights pre-transposed in the wrapper); f32 accumulation.
    o_ref[0] = (jnp.dot(kx, wk_ref[...], preferred_element_type=jnp.float32)
                + bk_ref[...]).astype(o_ref.dtype)
    o_ref[1] = (jnp.dot(vx, wv_ref[...], preferred_element_type=jnp.float32)
                + bv_ref[...]).astype(o_ref.dtype)
    o_ref[2] = (jnp.dot(qx, wq_ref[...], preferred_element_type=jnp.float32)
                + bq_ref[...]).astype(o_ref.dtype)


def _qkv_projection(xs, wTs, bs, *, shared, out_dtype, vmem_limit, budget):
    # xs: 1 (self-attn) or 3 activation arrays (N, K); wTs: 3 x (K, Mo) weights
    # already stored as (in, out); bs: 3 x (1, Mo) f32 biases.
    N, K = xs[0].shape
    Mo = wTs[0].shape[1]
    itm = jnp.dtype(out_dtype).itemsize
    row_align = 16 if itm < 4 else 8
    tn = _pick_tile(Mo, 512, align=128)
    tm = _pick_tile(N, 512, align=row_align, min_steps=2)

    def _need(tm_, tn_):  # double-buffered working set per grid step
        return 2 * (len(xs) * tm_ * K * itm + 3 * K * tn_ * itm
                    + 3 * tn_ * 4 + 3 * tm_ * tn_ * itm)

    while _need(tm, tn) > budget and tm > row_align:
        new_tm = _pick_tile(N, tm // 2, align=row_align, min_steps=2)
        if new_tm >= tm:
            break
        tm = new_tm

    grid = (N // tm, Mo // tn)
    x_specs = [pl.BlockSpec((tm, K), lambda i, j: (i, 0)) for _ in xs]
    w_specs = [pl.BlockSpec((K, tn), lambda i, j: (0, j)) for _ in wTs]
    b_specs = [pl.BlockSpec((1, tn), lambda i, j: (0, j)) for _ in bs]

    flops = 2 * 3 * N * K * Mo
    bytes_accessed = (itm * (len(xs) * N * K + 3 * K * Mo + 3 * N * Mo)
                      + 4 * 3 * Mo)

    return pl.pallas_call(
        functools.partial(_qkv_kernel, shared=shared),
        out_shape=jax.ShapeDtypeStruct((3, N, Mo), out_dtype),
        grid=grid,
        in_specs=x_specs + w_specs + b_specs,
        out_specs=pl.BlockSpec((3, tm, tn), lambda i, j: (0, i, j)),
        compiler_params=pltpu.CompilerParams(
            dimension_semantics=("parallel", "parallel"),
            vmem_limit_bytes=vmem_limit),
        cost_estimate=pl.CostEstimate(flops=flops, transcendentals=0,
                                      bytes_accessed=bytes_accessed),
    )(*xs, *wTs, *bs)


# ------------------------ scaled dot-product attention ------------------------

def _attn_kernel(k_ref, v_ref, q_ref, ctx_ref, attn_ref, *, scale):
    q, k, v = q_ref[...], k_ref[...], v_ref[...]
    # scores[b, i, j] = sum_d q[b, i, d] * k[b, j, d]   (f32 accumulation)
    s = lax.dot_general(q, k, (((2,), (2,)), ((0,), (0,))),
                        preferred_element_type=jnp.float32) * scale
    s = s - jnp.max(s, axis=-1, keepdims=True)
    e = jnp.exp(s)
    # approx reciprocal -> EUP slot (otherwise idle here); frees VALU cycles.
    a = e * pl.reciprocal(jnp.sum(e, axis=-1, keepdims=True), approx=True)
    attn_ref[...] = a.astype(attn_ref.dtype)
    # ctx[b, i, d] = sum_j a[b, i, j] * v[b, j, d]
    ctx_ref[...] = lax.dot_general(
        a.astype(v.dtype), v, (((2,), (1,)), ((0,), (0,))),
        preferred_element_type=jnp.float32).astype(ctx_ref.dtype)


def _scaled_dot_product_attention(kvq, *, scale, attn_dtype, vmem_limit, budget):
    # kvq: (3, BH, S, D) projection buffer; [0]=K, [1]=V, [2]=Q.
    _, BH, S, D = kvq.shape
    cdt = kvq.dtype
    itm = jnp.dtype(cdt).itemsize
    # Double-buffered in/out blocks + f32 in-kernel temporaries, per head.
    per_head = (2 * itm * 4 * S * D                          # q, k, v + ctx
                + 2 * jnp.dtype(attn_dtype).itemsize * S * S  # attn output
                + 16 * S * S + 8 * S * D)                     # f32 scores/probs
    cap = max(1, min(BH, budget // max(per_head, 1)))
    # Keep ~8 grid steps so DMAs pipeline and v7x can split the parallel axis.
    cap = min(cap, max(1, BH // 8))
    bh = cap
    while bh > 1 and BH % bh:
        bh -= 1
    grid = (BH // bh,)

    flops = 4 * BH * S * S * D
    bytes_accessed = (itm * 4 * BH * S * D
                      + jnp.dtype(attn_dtype).itemsize * BH * S * S)

    return pl.pallas_call(
        functools.partial(_attn_kernel, scale=scale),
        out_shape=(jax.ShapeDtypeStruct((BH, S, D), cdt),
                   jax.ShapeDtypeStruct((BH, S, S), attn_dtype)),
        grid=grid,
        in_specs=[
            pl.BlockSpec((None, bh, S, D), lambda i: (0, i, 0, 0)),  # K
            pl.BlockSpec((None, bh, S, D), lambda i: (1, i, 0, 0)),  # V
            pl.BlockSpec((None, bh, S, D), lambda i: (2, i, 0, 0)),  # Q
        ],
        out_specs=(
            pl.BlockSpec((bh, S, D), lambda i: (i, 0, 0)),
            pl.BlockSpec((bh, S, S), lambda i: (i, 0, 0)),
        ),
        compiler_params=pltpu.CompilerParams(
            dimension_semantics=("parallel",),
            vmem_limit_bytes=vmem_limit),
        cost_estimate=pl.CostEstimate(flops=flops, transcendentals=BH * S * S,
                                      bytes_accessed=bytes_accessed),
    )(kvq, kvq, kvq)


# --------------- linear_final + residual + LayerNorm (fused) ------------------

def _final_kernel(ctx_ref, wT_ref, b_ref, res_ref, g_ref, beta_ref, o_ref,
                  *, eps, tn, kt):
    j = pl.program_id(1)
    y = (jnp.dot(ctx_ref[...], wT_ref[...], preferred_element_type=jnp.float32)
         + b_ref[...])
    if kt == 1:                 # trace-time constant: single feature tile
        o_ref[...] = y.astype(o_ref.dtype)
    else:                       # partial-column store; finalize at the last j
        start = pl.multiple_of(j * tn, tn)
        o_ref[:, pl.ds(start, tn)] = y.astype(o_ref.dtype)

    @pl.when(j == kt - 1)
    def _():
        z = o_ref[...].astype(jnp.float32) + res_ref[...]
        mean = jnp.mean(z, axis=-1, keepdims=True)
        var = jnp.mean((z - mean) ** 2, axis=-1, keepdims=True)
        zn = (z - mean) * lax.rsqrt(var + eps)
        o_ref[...] = (zn * g_ref[...] + beta_ref[...]).astype(o_ref.dtype)


def _final(ctx, wT, b, res, gamma, beta, *, eps, vmem_limit, budget):
    N, K = ctx.shape
    Mo = wT.shape[1]
    itm = jnp.dtype(ctx.dtype).itemsize
    row_align = 16 if itm < 4 else 8
    tn = _pick_tile(Mo, 512, align=128)
    tm = _pick_tile(N, 512, align=row_align, min_steps=2)

    def _need(tm_, tn_):
        return 2 * (tm_ * K * itm + K * tn_ * itm + tn_ * 4
                    + tm_ * Mo * 4 + 2 * Mo * 4 + tm_ * Mo * 4)

    while _need(tm, tn) > budget and tm > row_align:
        new_tm = _pick_tile(N, tm // 2, align=row_align, min_steps=2)
        if new_tm >= tm:
            break
        tm = new_tm

    kt = Mo // tn
    grid = (N // tm, kt)
    kernel = functools.partial(_final_kernel, eps=eps, tn=tn, kt=kt)
    return pl.pallas_call(
        kernel,
        out_shape=jax.ShapeDtypeStruct((N, Mo), jnp.float32),
        grid=grid,
        in_specs=[
            pl.BlockSpec((tm, K), lambda i, j: (i, 0)),    # ctx (compute dtype)
            pl.BlockSpec((K, tn), lambda i, j: (0, j)),    # W_final^T
            pl.BlockSpec((1, tn), lambda i, j: (0, j)),    # bias
            pl.BlockSpec((tm, Mo), lambda i, j: (i, 0)),   # residual (f32)
            pl.BlockSpec((1, Mo), lambda i, j: (0, 0)),    # gamma
            pl.BlockSpec((1, Mo), lambda i, j: (0, 0)),    # beta
        ],
        out_specs=pl.BlockSpec((tm, Mo), lambda i, j: (i, 0)),
        compiler_params=pltpu.CompilerParams(
            dimension_semantics=("parallel", "arbitrary"),
            vmem_limit_bytes=vmem_limit),
        cost_estimate=pl.CostEstimate(
            flops=2 * N * K * Mo + 10 * N * Mo, transcendentals=N,
            bytes_accessed=itm * (N * K + K * Mo) + 4 * (2 * N * Mo + 3 * Mo)),
    )(ctx, wT, b, res, gamma, beta)


# ------------------------------ module forward --------------------------------

def multi_head_attention(key_x, value_x, query_x, params, num_heads,
                         compute_dtype=jnp.bfloat16,
                         attn_weights_dtype=jnp.float32):
    """Pallas forward of MultiHeadAttention (attn_mask=None, dropout=0).

    compute_dtype: dtype of MXU matmul operands / intermediate K,V,Q,ctx
      buffers (bf16 default: ~2x MXU throughput on v6e/v7x, half the
      intermediate HBM traffic; softmax / LayerNorm math stays f32).
    attn_weights_dtype: dtype of the returned attention weights (f32 matches
      the PyTorch module; bf16 halves the dominant BH*S*S write for large S).
    """
    B, S, M = query_x.shape
    H = num_heads
    D = M // H
    N = B * S
    cdt = jnp.dtype(compute_dtype)
    vmem_limit, budget = _vmem_limits()

    residual = query_x.reshape(N, M).astype(jnp.float32)

    # Pre-transpose (+cast) weights ONCE outside the kernels -> plain NN dots
    # inside (no per-grid-step transposed MXU push / XLU work).  In a real
    # model the weights would simply be stored pre-transposed.
    wkT = params["wk"].T.astype(cdt)
    wvT = params["wv"].T.astype(cdt)
    wqT = params["wq"].T.astype(cdt)
    wfT = params["wf"].T.astype(cdt)
    bk = params["bk"].reshape(1, M).astype(jnp.float32)
    bv = params["bv"].reshape(1, M).astype(jnp.float32)
    bq = params["bq"].reshape(1, M).astype(jnp.float32)
    bf = params["bf"].reshape(1, M).astype(jnp.float32)

    shared = (key_x is query_x) and (value_x is query_x)
    if shared:
        xs = [query_x.reshape(N, M).astype(cdt)]   # self-attention: read x once
    else:
        xs = [key_x.reshape(N, M).astype(cdt),
              value_x.reshape(N, M).astype(cdt),
              query_x.reshape(N, M).astype(cdt)]

    # (3, N, M): [0]=K, [1]=V, [2]=Q -- single buffer, no jnp.stack round-trip.
    kvq = _qkv_projection(xs, [wkT, wvT, wqT], [bk, bv, bq],
                          shared=shared, out_dtype=cdt,
                          vmem_limit=vmem_limit, budget=budget)

    # PyTorch `.view(B*H, -1, D)` is a plain row-major reshape (NOT the
    # canonical transpose-based head split): metadata only, no copy.  The
    # attention kernel then reads K/V/Q straight from this buffer via pinned
    # leading-axis index_maps (no XLA slice copies).
    kvq = kvq.reshape(3, B * H, S, D)

    scale = float(D) ** (-0.5)
    ctx, attention = _scaled_dot_product_attention(
        kvq, scale=scale, attn_dtype=jnp.dtype(attn_weights_dtype),
        vmem_limit=vmem_limit, budget=budget)

    # `.view(B, -1, D*H)` -> flat row-major reshape again (free).
    ctx = ctx.reshape(N, M)

    out = _final(ctx, wfT, bf, residual,
                 params["gamma"].reshape(1, M).astype(jnp.float32),
                 params["beta"].reshape(1, M).astype(jnp.float32),
                 eps=1e-5, vmem_limit=vmem_limit, budget=budget)
    return out.reshape(B, S, M), attention


# ------------------------------ JAX reference ---------------------------------

def _reference(key_x, value_x, query_x, params, num_heads):
    B, S, M = query_x.shape
    D = M // num_heads
    res = query_x
    k = key_x @ params["wk"].T + params["bk"]
    v = value_x @ params["wv"].T + params["bv"]
    q = query_x @ params["wq"].T + params["bq"]
    k = k.reshape(B * num_heads, -1, D)
    v = v.reshape(B * num_heads, -1, D)
    q = q.reshape(B * num_heads, -1, D)
    scores = jnp.einsum("bqd,bkd->bqk", q, k) * (float(D) ** -0.5)
    attn = jax.nn.softmax(scores, axis=-1)
    ctx = jnp.einsum("bqk,bkd->bqd", attn, v)
    ctx = ctx.reshape(B, -1, M)
    out = ctx @ params["wf"].T + params["bf"]
    z = res + out
    mean = z.mean(-1, keepdims=True)
    var = ((z - mean) ** 2).mean(-1, keepdims=True)
    out = (z - mean) / jnp.sqrt(var + 1e-5) * params["gamma"] + params["beta"]
    return out, attn


# ----------------------------------- main --------------------------------------

if __name__ == "__main__":
    model_dim = 32
    num_heads = 4
    batch = 2
    seq = 8

    root = jax.random.PRNGKey(0)
    keys = jax.random.split(root, 12)

    def init_w(k, shape, scale=0.1):
        return (scale * jax.random.normal(k, shape)).astype(jnp.float32)

    params = {
        "wk": init_w(keys[0], (model_dim, model_dim)),
        "bk": init_w(keys[1], (model_dim,)),
        "wv": init_w(keys[2], (model_dim, model_dim)),
        "bv": init_w(keys[3], (model_dim,)),
        "wq": init_w(keys[4], (model_dim, model_dim)),
        "bq": init_w(keys[5], (model_dim,)),
        "wf": init_w(keys[6], (model_dim, model_dim)),
        "bf": init_w(keys[7], (model_dim,)),
        "gamma": jnp.ones((model_dim,), jnp.float32),
        "beta": jnp.zeros((model_dim,), jnp.float32),
    }

    key_x = jax.random.normal(keys[8], (batch, seq, model_dim), jnp.float32)
    value_x = jax.random.normal(keys[9], (batch, seq, model_dim), jnp.float32)
    query_x = jax.random.normal(keys[10], (batch, seq, model_dim), jnp.float32)

    # --- cross-attention, default bf16 matmul operands ------------------------
    out, attn = multi_head_attention(key_x, value_x, query_x, params, num_heads)
    out = jax.block_until_ready(out)
    attn = jax.block_until_ready(attn)
    ref_out, ref_attn = _reference(key_x, value_x, query_x, params, num_heads)
    assert out.shape == (batch, seq, model_dim)
    assert attn.shape == (batch * num_heads, seq, seq)
    # bf16 matmul operands + EUP approx reciprocal -> relaxed tolerances.
    assert jnp.allclose(out, ref_out, atol=3e-2, rtol=3e-2)
    assert jnp.allclose(attn, ref_attn, atol=1e-2, rtol=1e-2)

    # --- self-attention, full-f32 path (exercises the shared-input kernel) ----
    out2, attn2 = multi_head_attention(query_x, query_x, query_x, params,
                                       num_heads, compute_dtype=jnp.float32)
    out2 = jax.block_until_ready(out2)
    attn2 = jax.block_until_ready(attn2)
    ref_out2, ref_attn2 = _reference(query_x, query_x, query_x, params,
                                     num_heads)
    assert jnp.allclose(out2, ref_out2, atol=2e-3, rtol=2e-3)
    assert jnp.allclose(attn2, ref_attn2, atol=2e-3, rtol=2e-3)

    print("KERNEL_OK")
</pallas_src>

<mosaic_0001>
module attributes {stable_mosaic.version = 11 : i64} {
  func.func @_qkv_kernel(%arg0: i32, %arg1: i32, %arg2: memref<16x32xbf16, #tpu.memory_space<vmem>>, %arg3: memref<16x32xbf16, #tpu.memory_space<vmem>>, %arg4: memref<16x32xbf16, #tpu.memory_space<vmem>>, %arg5: memref<32x32xbf16, #tpu.memory_space<vmem>>, %arg6: memref<32x32xbf16, #tpu.memory_space<vmem>>, %arg7: memref<32x32xbf16, #tpu.memory_space<vmem>>, %arg8: memref<1x32xf32, #tpu.memory_space<vmem>>, %arg9: memref<1x32xf32, #tpu.memory_space<vmem>>, %arg10: memref<1x32xf32, #tpu.memory_space<vmem>>, %arg11: memref<3x16x32xbf16, #tpu.memory_space<vmem>>) attributes {dimension_semantics = [#tpu.dimension_semantics<parallel>, #tpu.dimension_semantics<parallel>], iteration_bounds = array<i64: 1, 1>, scalar_prefetch = 0 : i64, scratch_operands = 0 : i64, tpu.core_type = #tpu.core_type<tc>, window_params = [{transform_indices = @transform_0, window_bounds = array<i64: 16, 32>}, {transform_indices = @transform_1, window_bounds = array<i64: 16, 32>}, {transform_indices = @transform_2, window_bounds = array<i64: 16, 32>}, {transform_indices = @transform_3, window_bounds = array<i64: 32, 32>}, {transform_indices = @transform_4, window_bounds = array<i64: 32, 32>}, {transform_indices = @transform_5, window_bounds = array<i64: 32, 32>}, {transform_indices = @transform_6, window_bounds = array<i64: 1, 32>}, {transform_indices = @transform_7, window_bounds = array<i64: 1, 32>}, {transform_indices = @transform_8, window_bounds = array<i64: 1, 32>}, {transform_indices = @transform_9, window_bounds = array<i64: 3, 16, 32>}]} {
    %c0 = arith.constant 0 : index
    %c0_0 = arith.constant 0 : index
    %0 = vector.load %arg2[%c0, %c0_0] : memref<16x32xbf16, #tpu.memory_space<vmem>>, vector<16x32xbf16>
    %c0_1 = arith.constant 0 : index
    %c0_2 = arith.constant 0 : index
    %1 = vector.load %arg3[%c0_1, %c0_2] : memref<16x32xbf16, #tpu.memory_space<vmem>>, vector<16x32xbf16>
    %c0_3 = arith.constant 0 : index
    %c0_4 = arith.constant 0 : index
    %2 = vector.load %arg4[%c0_3, %c0_4] : memref<16x32xbf16, #tpu.memory_space<vmem>>, vector<16x32xbf16>
    %c0_5 = arith.constant 0 : index
    %c0_6 = arith.constant 0 : index
    %3 = vector.load %arg5[%c0_5, %c0_6] : memref<32x32xbf16, #tpu.memory_space<vmem>>, vector<32x32xbf16>
    %cst = arith.constant dense<0.000000e+00> : vector<16x32xf32>
    %4 = tpu.matmul %0, %3, %cst {dimension_numbers = #tpu.dot_dimension_numbers<[1], [0], [0], [1], [0, 0, 1, 1], [], []>} : vector<16x32xbf16>, vector<32x32xbf16>, vector<16x32xf32> -> vector<16x32xf32>
    %c0_7 = arith.constant 0 : index
    %c0_8 = arith.constant 0 : index
    %5 = vector.load %arg8[%c0_7, %c0_8] : memref<1x32xf32, #tpu.memory_space<vmem>>, vector<1x32xf32>
    %6 = vector.broadcast %5 : vector<1x32xf32> to vector<16x32xf32>
    %7 = arith.addf %4, %6 : vector<16x32xf32>
    %8 = arith.truncf %7 : vector<16x32xf32> to vector<16x32xbf16>
    %c0_9 = arith.constant 0 : index
    %c0_10 = arith.constant 0 : index
    %c0_11 = arith.constant 0 : index
    %9 = vector.load %arg11[%c0_9, %c0_10, %c0_11] : memref<3x16x32xbf16, #tpu.memory_space<vmem>>, vector<1x16x32xbf16>
    %10 = vector.shape_cast %9 : vector<1x16x32xbf16> to vector<16x32xbf16>
    %11 = vector.shape_cast %8 : vector<16x32xbf16> to vector<1x16x32xbf16>
    tpu.vector_store %arg11[%c0_9, %c0_10, %c0_11], %11 {strides = array<i32>} : memref<3x16x32xbf16, #tpu.memory_space<vmem>>, vector<1x16x32xbf16>,
    %c0_12 = arith.constant 0 : index
    %c0_13 = arith.constant 0 : index
    %12 = vector.load %arg6[%c0_12, %c0_13] : memref<32x32xbf16, #tpu.memory_space<vmem>>, vector<32x32xbf16>
    %cst_14 = arith.constant dense<0.000000e+00> : vector<16x32xf32>
    %13 = tpu.matmul %1, %12, %cst_14 {dimension_numbers = #tpu.dot_dimension_numbers<[1], [0], [0], [1], [0, 0, 1, 1], [], []>} : vector<16x32xbf16>, vector<32x32xbf16>, vector<16x32xf32> -> vector<16x32xf32>
    %c0_15 = arith.constant 0 : index
    %c0_16 = arith.constant 0 : index
    %14 = vector.load %arg9[%c0_15, %c0_16] : memref<1x32xf32, #tpu.memory_space<vmem>>, vector<1x32xf32>
    %15 = vector.broadcast %14 : vector<1x32xf32> to vector<16x32xf32>
    %16 = arith.addf %13, %15 : vector<16x32xf32>
    %17 = arith.truncf %16 : vector<16x32xf32> to vector<16x32xbf16>
    %c1 = arith.constant 1 : index
    %c0_17 = arith.constant 0 : index
    %c0_18 = arith.constant 0 : index
    %18 = vector.load %arg11[%c1, %c0_17, %c0_18] : memref<3x16x32xbf16, #tpu.memory_space<vmem>>, vector<1x16x32xbf16>
    %19 = vector.shape_cast %18 : vector<1x16x32xbf16> to vector<16x32xbf16>
    %20 = vector.shape_cast %17 : vector<16x32xbf16> to vector<1x16x32xbf16>
    tpu.vector_store %arg11[%c1, %c0_17, %c0_18], %20 {strides = array<i32>} : memref<3x16x32xbf16, #tpu.memory_space<vmem>>, vector<1x16x32xbf16>,
    %c0_19 = arith.constant 0 : index
    %c0_20 = arith.constant 0 : index
    %21 = vector.load %arg7[%c0_19, %c0_20] : memref<32x32xbf16, #tpu.memory_space<vmem>>, vector<32x32xbf16>
    %cst_21 = arith.constant dense<0.000000e+00> : vector<16x32xf32>
    %22 = tpu.matmul %2, %21, %cst_21 {dimension_numbers = #tpu.dot_dimension_numbers<[1], [0], [0], [1], [0, 0, 1, 1], [], []>} : vector<16x32xbf16>, vector<32x32xbf16>, vector<16x32xf32> -> vector<16x32xf32>
    %c0_22 = arith.constant 0 : index
    %c0_23 = arith.constant 0 : index
    %23 = vector.load %arg10[%c0_22, %c0_23] : memref<1x32xf32, #tpu.memory_space<vmem>>, vector<1x32xf32>
    %24 = vector.broadcast %23 : vector<1x32xf32> to vector<16x32xf32>
    %25 = arith.addf %22, %24 : vector<16x32xf32>
    %26 = arith.truncf %25 : vector<16x32xf32> to vector<16x32xbf16>
    %c2 = arith.constant 2 : index
    %c0_24 = arith.constant 0 : index
    %c0_25 = arith.constant 0 : index
    %27 = vector.load %arg11[%c2, %c0_24, %c0_25] : memref<3x16x32xbf16, #tpu.memory_space<vmem>>, vector<1x16x32xbf16>
    %28 = vector.shape_cast %27 : vector<1x16x32xbf16> to vector<16x32xbf16>
    %29 = vector.shape_cast %26 : vector<16x32xbf16> to vector<1x16x32xbf16>
    tpu.vector_store %arg11[%c2, %c0_24, %c0_25], %29 {strides = array<i32>} : memref<3x16x32xbf16, #tpu.memory_space<vmem>>, vector<1x16x32xbf16>,
    return
  }
  func.func @transform_0(%arg0: i32, %arg1: i32) -> (i32, i32) {
    %c0_i32 = arith.constant 0 : i32
    %c0_i32_0 = arith.constant 0 : i32
    return %arg0, %c0_i32 : i32, i32
  }
  func.func @transform_1(%arg0: i32, %arg1: i32) -> (i32, i32) {
    %c0_i32 = arith.constant 0 : i32
    %c0_i32_0 = arith.constant 0 : i32
    return %arg0, %c0_i32 : i32, i32
  }
  func.func @transform_2(%arg0: i32, %arg1: i32) -> (i32, i32) {
    %c0_i32 = arith.constant 0 : i32
    %c0_i32_0 = arith.constant 0 : i32
    return %arg0, %c0_i32 : i32, i32
  }
  func.func @transform_3(%arg0: i32, %arg1: i32) -> (i32, i32) {
    %c0_i32 = arith.constant 0 : i32
    %c0_i32_0 = arith.constant 0 : i32
    return %c0_i32, %arg1 : i32, i32
  }
  func.func @transform_4(%arg0: i32, %arg1: i32) -> (i32, i32) {
    %c0_i32 = arith.constant 0 : i32
    %c0_i32_0 = arith.constant 0 : i32
    return %c0_i32, %arg1 : i32, i32
  }
  func.func @transform_5(%arg0: i32, %arg1: i32) -> (i32, i32) {
    %c0_i32 = arith.constant 0 : i32
    %c0_i32_0 = arith.constant 0 : i32
    return %c0_i32, %arg1 : i32, i32
  }
  func.func @transform_6(%arg0: i32, %arg1: i32) -> (i32, i32) {
    %c0_i32 = arith.constant 0 : i32
    %c0_i32_0 = arith.constant 0 : i32
    return %c0_i32, %arg1 : i32, i32
  }
  func.func @transform_7(%arg0: i32, %arg1: i32) -> (i32, i32) {
    %c0_i32 = arith.constant 0 : i32
    %c0_i32_0 = arith.constant 0 : i32
    return %c0_i32, %arg1 : i32, i32
  }
  func.func @transform_8(%arg0: i32, %arg1: i32) -> (i32, i32) {
    %c0_i32 = arith.constant 0 : i32
    %c0_i32_0 = arith.constant 0 : i32
    return %c0_i32, %arg1 : i32, i32
  }
  func.func @transform_9(%arg0: i32, %arg1: i32) -> (i32, i32, i32) {
    %c0_i32 = arith.constant 0 : i32
    %c0_i32_0 = arith.constant 0 : i32
    return %c0_i32, %arg0, %arg1 : i32, i32, i32
  }
}

</mosaic_0001>

<bundles_post_ra>
// kernel: tpu_custom_call.1
= control target key start
LH: loop header
LB: loop body
LE: loop exit
PB: predicated region body
PF: predicated region fallthrough
CT: control target
= control target key end

     0   :  { %14 = vsyncpa [#allocation3], 0  ;;  %s784_s0 = inlined_call_operand.hbm [shape: bf16[16,32], index: 0, kind: input, shape index: {}]   ;;  %s785_s1 = inlined_call_operand.hbm [shape: bf16[16,32], index: 1, kind: input, shape index: {}]   ;;  %s786_s2 = inlined_call_operand.hbm [shape: bf16[16,32], index: 2, kind: input, shape index: {}]   ;;  %s787_s3 = inlined_call_operand.hbm [shape: bf16[32,32], index: 3, kind: input, shape index: {}]   ;;  %s788_s4 = inlined_call_operand.hbm [shape: bf16[32,32], index: 4, kind: input, shape index: {}]   ;;  %s789_s5 = inlined_call_operand.vmem [shape: bf16[32,32], index: 5, kind: input, shape index: {}]   ;;  %s790_s6 = inlined_call_operand.vmem [shape: f32[1,32], index: 6, kind: input, shape index: {}]   ;;  %s791_s7 = inlined_call_operand.vmem [shape: f32[1,32], index: 7, kind: input, shape index: {}]   ;;  %s792_s8 = inlined_call_operand.vmem [shape: f32[1,32], index: 8, kind: input, shape index: {}]   ;;  %s793_s9 = inlined_call_operand.hbm [shape: bf16[3,16,32], index: 9, kind: output, shape index: {}]  }
   0x1   :  { %15 = vsyncpa [#allocation6], 0 }
   0x2   :  { %16 = vsyncpa [#allocation9], 0 }
   0x3   :  { %17 = vsyncpa [#allocation4], 0  ;;  %s596_s30 = smov [#allocation5]   ;;  %s597_s11 = smov [#allocation8]  }
   0x4   :  { %s35_s10 = sshll.u32 %s596_s30, 4  ;;  %s59_s12 = sshll.u32 %s597_s11, 4  ;;  %s36_s10 = int_to_ptr.vmem [resolvable:$true] %s35_s10  ;;  %s656_s12 = int_to_ptr.vmem [resolvable:$true] %s59_s12 }
   0x5   :  { %s456_s15 = scalar_lea.hbm %s785_s1, 128 }
   0x6   :  { %p457_p0 = scmp.ne.s32.totalorder %s785_s1, %s456_s15  ;;  %p460_p1 = scmp.lt.u32.totalorder %s456_s15, %s785_s1 }
   0x8   :  { %p462_p2 = pnand %p460_p1, %p457_p0 }
   0xa   :  { %465 = shalt.err (!%p462_p2)
}
   0xb   :  { %s466_s20 = scalar_lea.vmem %s36_s10, 128  ;;  %p471_p4 = scmp.lt.s32.totalorder %s36_s10, %s36_s10 }
   0xc   :  { %p467_p3 = scmp.ne.s32.totalorder %s36_s10, %s466_s20  ;;  %p472_p5 = scmp.lt.s32.totalorder %s466_s20, %s466_s20 }
   0xe   :  { %p473_p6 = por %p472_p5, %p471_p4 }
  0x10   :  { %p474_p7 = pnand %p473_p6, %p467_p3 }
  0x12   :  { %477 = shalt.err (!%p474_p7)
}
  0x13   :  { %s598_s21 = smov 64   ;;  %s599_s22 = smov 4  }
  0x14   :  { %41 = dma.hbm_to_vmem [thread:$0]  %s785_s1, 128, %s36_s10, [#allocation6], %s598_s21, %s598_s21, %s599_s22  }
  0x15   :  { %s478_s27 = scalar_lea.hbm %s787_s3, 256 }
  0x16   :  { %p479_p8 = scmp.ne.s32.totalorder %s787_s3, %s478_s27  ;;  %p482_p9 = scmp.lt.u32.totalorder %s478_s27, %s787_s3 }
  0x18   :  { %p484_p10 = pnand %p482_p9, %p479_p8 }
  0x1a   :  { %487 = shalt.err (!%p484_p10)
}
  0x1b   :  { %s488_s13 = scalar_lea.vmem %s656_s12, 256  ;;  %p493_p12 = scmp.lt.s32.totalorder %s656_s12, %s656_s12 }
  0x1c   :  { %p489_p11 = scmp.ne.s32.totalorder %s656_s12, %s488_s13  ;;  %p494_p13 = scmp.lt.s32.totalorder %s488_s13, %s488_s13 }
  0x1e   :  { %p495_p0 = por %p494_p13, %p493_p12 }
  0x20   :  { %p496_p1 = pnand %p495_p0, %p489_p11 }
  0x22   :  { %499 = shalt.err (!%p496_p1)
}
  0x23   :  { %65 = dma.hbm_to_vmem [thread:$0]  %s787_s3, 256, %s656_s12, [#allocation9], %s598_s21, %s598_s21, %s599_s22  }
  0x24   :  { %s600_s14 = smov [#allocation2]   ;;  %s601_s16 = smov [#allocation7]  }
  0x25   :  { %s23_s15 = sshll.u32 %s600_s14, 4  ;;  %s47_s17 = sshll.u32 %s601_s16, 4  ;;  %s24_s15 = int_to_ptr.vmem [resolvable:$true] %s23_s15  ;;  %s693_s17 = int_to_ptr.vmem [resolvable:$true] %s47_s17 }
  0x26   :  { %s500_s20 = scalar_lea.hbm %s784_s0, 128 }
  0x27   :  { %p501_p2 = scmp.ne.s32.totalorder %s784_s0, %s500_s20  ;;  %p504_p3 = scmp.lt.u32.totalorder %s500_s20, %s784_s0 }
  0x29   :  { %p506_p4 = pnand %p504_p3, %p501_p2 }
  0x2b   :  { %509 = shalt.err (!%p506_p4)
}
  0x2c   :  { %s510_s3 = scalar_lea.vmem %s24_s15, 128  ;;  %p515_p6 = scmp.lt.s32.totalorder %s24_s15, %s24_s15 }
  0x2d   :  { %p511_p5 = scmp.ne.s32.totalorder %s24_s15, %s510_s3  ;;  %p516_p7 = scmp.lt.s32.totalorder %s510_s3, %s510_s3 }
  0x2f   :  { %p517_p8 = por %p516_p7, %p515_p6 }
  0x31   :  { %p518_p9 = pnand %p517_p8, %p511_p5 }
  0x33   :  { %521 = shalt.err (!%p518_p9)
}
  0x34   :  { %29 = dma.hbm_to_vmem [thread:$0]  %s784_s0, 128, %s24_s15, [#allocation3], %s598_s21, %s598_s21, %s599_s22  }
  0x35   :  { %s522_s30 = scalar_lea.hbm %s786_s2, 128 }
  0x36   :  { %p523_p10 = scmp.ne.s32.totalorder %s786_s2, %s522_s30  ;;  %p526_p11 = scmp.lt.u32.totalorder %s522_s30, %s786_s2 }
  0x38   :  { %p528_p12 = pnand %p526_p11, %p523_p10 }
  0x3a   :  { %531 = shalt.err (!%p528_p12)
}
  0x3b   :  { %s532_s14 = scalar_lea.vmem %s693_s17, 128  ;;  %p537_p0 = scmp.lt.s32.totalorder %s693_s17, %s693_s17 }
  0x3c   :  { %p533_p13 = scmp.ne.s32.totalorder %s693_s17, %s532_s14  ;;  %p538_p1 = scmp.lt.s32.totalorder %s532_s14, %s532_s14 }
  0x3e   :  { %p539_p2 = por %p538_p1, %p537_p0 }
  0x40   :  { %p540_p3 = pnand %p539_p2, %p533_p13 }
  0x42   :  { %543 = shalt.err (!%p540_p3)
}
  0x43   :  { %53 = dma.hbm_to_vmem [thread:$0]  %s786_s2, 128, %s693_s17, [#allocation6], %s598_s21, %s598_s21, %s599_s22  }
  0x44   :  { %s602_s16 = smov [#allocation10]   ;;  %s544_s23 = scalar_lea.hbm %s788_s4, 256 }
  0x45   :  { %s71_s18 = sshll.u32 %s602_s16, 4  ;;  %p545_p4 = scmp.ne.s32.totalorder %s788_s4, %s544_s23  ;;  %s72_s18 = int_to_ptr.vmem [resolvable:$true] %s71_s18 }
  0x46   :  { %p548_p5 = scmp.lt.u32.totalorder %s544_s23, %s788_s4 }
  0x48   :  { %p550_p6 = pnand %p548_p5, %p545_p4 }
  0x4a   :  { %553 = shalt.err (!%p550_p6)
}
  0x4b   :  { %s554_s12 = scalar_lea.vmem %s72_s18, 256  ;;  %p559_p8 = scmp.lt.s32.totalorder %s72_s18, %s72_s18 }
  0x4c   :  { %p555_p7 = scmp.ne.s32.totalorder %s72_s18, %s554_s12  ;;  %p560_p9 = scmp.lt.s32.totalorder %s554_s12, %s554_s12 }
  0x4e   :  { %p561_p10 = por %p560_p9, %p559_p8 }
  0x50   :  { %p562_p11 = pnand %p561_p10, %p555_p7 }
  0x52   :  { %565 = shalt.err (!%p562_p11)
}
  0x53   :  { %77 = dma.hbm_to_vmem [thread:$0]  %s788_s4, 256, %s72_s18, [#allocation9], %s598_s21, %s598_s21, %s599_s22  }
  0x54   :  { %588 = dma.done.wait [#allocation3], 128  }
  0x55   :  { %589 = vsyncadd [#allocation3], 4294967168 }
  0x56   :  { %590 = dma.done.wait [#allocation6], 256  }
  0x57   :  { %591 = vsyncadd [#allocation6], 4294967040 }
  0x58   :  { %592 = dma.done.wait [#allocation9], 512  }
  0x59   :  { %593 = vsyncadd [#allocation9], 4294966784  ;;  %v603_v0 = vmov 0.0   ;;  %vm604_vm0 = vmmov 0   ;;  %v447_v1 = vld [vmem:[#allocation8] sm:$0xff]   ;;  %v448_v2 = vld [vmem:[#allocation8 + $0x8] sm:$0xff]  }
  0x5a   :  { %413 = vmatprep.subr.bf16.mxu0 %v603_v0  ;;  %421 = vmatprep.subr.bf16.mxu1 %v603_v0  ;;  %v449_v3 = vld [vmem:[#allocation10] sm:$0xff]   ;;  %v450_v4 = vld [vmem:[#allocation2] sm:$0xff]   ;;  %v452_v5 = vld [vmem:[#allocation10 + $0x8] sm:$0xff]   ;;  %vm136_vm1 = vcmask 261120   ;;  %vm189_vm2 = vcmask 257024  }
  0x5b   :  { %417 = vmatprep.mubr.msk.bf16.mxu0 %vm604_vm0, %v603_v0  ;;  %425 = vmatprep.mubr.msk.bf16.mxu1 %vm604_vm0, %v603_v0  ;;  %v451_v6 = vld [vmem:[%s789_s5] sm:$0xff]   ;;  %v454_v7 = vld [vmem:[#allocation5] sm:$0xff]   ;;  %v453_v8 = vld [vmem:[%s789_s5 + $0x8] sm:$0xff]  }
  0x5c   :  { %414 = vmatpush3.bf16.msra.mxu0 %v447_v1  ;;  %422 = vmatpush3.bf16.msra.mxu1 %v449_v3  ;;  %v455_v9 = vld [vmem:[#allocation7] sm:$0xff]  }
  0x5d   :  { %415 = vmatprep.subr.bf16.mxu0 %v603_v0  ;;  %423 = vmatprep.subr.bf16.mxu1 %v603_v0  ;;  %v377_v10 = vld [vmem:[%s790_s6] ss:$0 sm:$0xff] }
  0x5e   :  { %v384_v12 = vld [vmem:[%s791_s7] ss:$0 sm:$0xff]  ;;  %s605_s7 = smov [#allocation11]  }
  0x5f   :  { %v391_v27 = vld [vmem:[%s792_s8] ss:$0 sm:$0xff]  ;;  %s363_s10 = sshll.u32 %s605_s7, 4  ;;  %s364_s10 = int_to_ptr.vmem [resolvable:$true] %s363_s10 }
  0x60   :  { %416 = vmatpush3.bf16.msra.mxu0 %v448_v2  ;;  %424 = vmatpush3.bf16.msra.mxu1 %v452_v5  ;;  %s566_s8 = scalar_lea.vmem %s364_s10, 384  ;;  %p571_p13 = scmp.lt.s32.totalorder %s364_s10, %s364_s10 }
  0x61   :  { %429 = vmatprep.subr.bf16.mxu0 %v603_v0  ;;  %p567_p12 = scmp.ne.s32.totalorder %s364_s10, %s566_s8  ;;  %p572_p0 = scmp.lt.s32.totalorder %s566_s8, %s566_s8 }
  0x63   :  { %418 = vmatmul.mubr.msk.bf16.vlgmr.msra.gmra.mrb[0].mxu0 %vm136_vm1, %v450_v4  ;;  %426 = vmatmul.mubr.msk.bf16.vlgmr.msra.gmra.mrb[0].mxu1 %vm136_vm1, %v454_v7  ;;  %p573_p1 = por %p572_p0, %p571_p13 }
  0x64   :  { %430 = vmatpush3.bf16.msra.mxu0 %v451_v6  ;;  %433 = vmatprep.mubr.msk.bf16.mxu0 %vm604_vm0, %v603_v0 }
  0x65   :  { %431 = vmatprep.subr.bf16.mxu0 %v603_v0  ;;  %p574_p2 = pnand %p573_p1, %p567_p12 }
  0x68   :  { %432 = vmatpush3.bf16.msra.mxu0 %v453_v8 }
  0x6b   :  { %434 = vmatmul.mubr.msk.bf16.vlgmr.msra.gmra.mrb[4].mxu0 %vm136_vm1, %v455_v9 }
 0x136   :  { %v174_v11 = vpop.f32.mrb[0].mxu0  ;;  %v257_v16 = vpop.f32.mrb[0].mxu1 }
 0x137   :  { %v175_v13 = vadd.f32 %v377_v10, %v174_v11  ;;  %v419_v14 = vpop.f32.mrb[1].mxu0  ;;  %v258_v20 = vadd.f32 %v384_v12, %v257_v16  ;;  %v427_v21 = vpop.f32.mrb[1].mxu1 }
 0x138   :  { %v177_v15 = vpop.f32.mrb[2].mxu0  ;;  %v260_v22 = vpop.f32.mrb[2].mxu1 }
 0x139   :  { %v398_v17 = vpack.c.bf16 %v175_v13, %v175_v13  ;;  %v178_v18 = vadd.f32 %v377_v10, %v177_v15  ;;  %v420_v19 = vpop.f32.mrb[3].mxu0  ;;  %v400_v24 = vpack.c.bf16 %v258_v20, %v258_v20  ;;  %v261_v25 = vadd.f32 %v384_v12, %v260_v22  ;;  %v428_v26 = vpop.f32.mrb[3].mxu1 }
 0x13b   :  { %190 = vst.msk [vmem:[#allocation11] sm:$0xf] %vm189_vm2, %v398_v17  ;;  %v399_v23 = vpack.c.bf16 %v178_v18, %v178_v18  ;;  %273 = vst.msk [vmem:[#allocation11 + $0x8] sm:$0xf] %vm189_vm2, %v400_v24  ;;  %v401_v28 = vpack.c.bf16 %v261_v25, %v261_v25 }
 0x13d   :  { %191 = vst.msk [vmem:[#allocation11 + $0x4] sm:$0xf] %vm189_vm2, %v399_v23  ;;  %274 = vst.msk [vmem:[#allocation11 + $0xc] sm:$0xf] %vm189_vm2, %v401_v28 }
 0x13e   :  { %v340_v29 = vpop.f32.mrb[4].mxu0 }
 0x13f   :  { %v341_v30 = vadd.f32 %v391_v27, %v340_v29  ;;  %v435_v31 = vpop.f32.mrb[5].mxu0 }
 0x140   :  { %v343_v32 = vpop.f32.mrb[6].mxu0 }
 0x141   :  { %v402_v33 = vpack.c.bf16 %v341_v30, %v341_v30  ;;  %v344_v34 = vadd.f32 %v391_v27, %v343_v32  ;;  %v436_v35 = vpop.f32.mrb[7].mxu0 }
 0x143   :  { %356 = vst.msk [vmem:[#allocation11 + $0x10] sm:$0xf] %vm189_vm2, %v402_v33  ;;  %v403_v36 = vpack.c.bf16 %v344_v34, %v344_v34 }
 0x145   :  { %357 = vst.msk [vmem:[#allocation11 + $0x14] sm:$0xf] %vm189_vm2, %v403_v36 }
 0x146   :  { %577 = shalt.err (!%p574_p2)
}
 0x147   :  { %s578_s15 = scalar_lea.hbm %s793_s9, 384 }
 0x148   :  { %p579_p3 = scmp.ne.s32.totalorder %s793_s9, %s578_s15  ;;  %p582_p4 = scmp.lt.u32.totalorder %s578_s15, %s793_s9 }
 0x14a   :  { %p584_p5 = pnand %p582_p4, %p579_p3 }
 0x14c   :  { %587 = shalt.err (!%p584_p5)
}
 0x14d   :  { %369 = dma.vmem_to_hbm [thread:$0]  %s364_s10, 384, %s793_s9, [#allocation4], %s598_s21, %s598_s21, %s599_s22  }
 0x14e   :  { %594 = dma.done.wait [#allocation4], 384  }
 0x14f   :  { %595 = vsyncadd [#allocation4], 4294966912 }
 0x150   :  { %373 = vsyncpa [#allocation3], 1 }
 0x151   :  { %374 = vsyncpa [#allocation6], 1 }
 0x152   :  { %375 = vsyncpa [#allocation9], 1 }
 0x153   :  { %376 = vsyncpa [#allocation4], 1 }

</bundles_post_ra>
